<compile_context>
chip_gen: v5e
topology: v5e:2x2
jax: 0.10.0
libtpu: 0.0.40
codegen_flags: <defaults>
</compile_context>

<pallas_src>
import math

import numpy as np
import jax
import jax.numpy as jnp
from jax.experimental import pallas as pl
from jax.experimental.pallas import tpu as pltpu


def _dft_matrices(n, n_out):
    """Ortho-normalized DFT matrix (n x n_out columns), real/imag parts (numpy)."""
    j = np.arange(n)[:, None].astype(np.float64)
    k = np.arange(n_out)[None, :].astype(np.float64)
    ang = -2.0 * np.pi * j * k / n
    scale = 1.0 / np.sqrt(n)
    return ((np.cos(ang) * scale).astype(np.float32),
            (np.sin(ang) * scale).astype(np.float32))


def _round_up(x, m):
    return ((x + m - 1) // m) * m


def _est_vmem_bytes(H, W, Wh, nb):
    """Rough per-step VMEM footprint for the chosen nb (images per block)."""
    qp = _round_up(max(nb * Wh, 1), 128)
    blk = H * nb * W * 4
    return (4 * blk                      # pred + targ blocks, double-buffered
            + 2 * 2 * H * H * 4          # stacked F_H (double-buffered)
            + 2 * nb * W * 2 * qp * 4    # block-diagonal F_W
            + 2 * 2 * H * nb * W * 4     # stage-A outputs (pred, targ)
            + 2 * 2 * H * 2 * qp * 4     # stage-B outputs
            + 8 * H * qp * 4)            # z_re / z_im / mag / diff slack


def _freq_loss_kernel(pred_ref, targ_ref, fh_ref, fwbd_ref, out_ref):
    g = pl.program_id(1)

    @pl.when(g == 0)
    def _init():
        out_ref[...] = jnp.zeros_like(out_ref)

    hh = pred_ref.shape[0]
    qp = fwbd_ref.shape[1] // 2          # lane-padded nb*Wh (multiple of 128)

    def half_spectrum_mag(x_ref):
        # Stage A (H-DFT): one lane-dense 2D matmul shared by all images in the
        # block (images live along lanes).  fh_ref = [F_h_re ; F_h_im].
        y = jnp.dot(fh_ref[...], x_ref[...],
                    preferred_element_type=jnp.float32)          # (2H, nb*W)
        # Stage B (W-DFT): one 2D matmul against the constant block-diagonal F_W
        # (columns: [re-half | im-half], Hermitian column weights folded in).
        z = jnp.dot(y, fwbd_ref[...],
                    preferred_element_type=jnp.float32)          # (2H, 2*qp)
        z_re = z[:hh, :qp] - z[hh:, qp:]
        z_im = z[:hh, qp:] + z[hh:, :qp]
        return jnp.sqrt(z_re * z_re + z_im * z_im)               # (H, qp)

    diff = jnp.abs(half_spectrum_mag(pred_ref) - half_spectrum_mag(targ_ref))
    # Lane-dense resident accumulator: pure VALU adds, unmasked stores.
    out_ref[...] += diff[None, :, :]


def frequency_loss(pred, target, *, nb=None, num_core_splits=1):
    """pred, target: (B, C, H, W). Scalar L1 loss on |fft2(., norm='ortho')|."""
    B, C, H, W = pred.shape
    N = B * C
    Wh = W // 2 + 1                       # rfft half-spectrum columns
    S = max(1, int(num_core_splits))

    if nb is None:
        # Cap 1 (MXU waste): the block-diagonal W-DFT does ~nb x the minimal
        # flops; keep the per-image MXU time comparable to the amortized
        # ~0.35us/step grid overhead -> nb ~ sqrt(0.35us * 5e13 / (8*H*W*Wh)).
        waste_cap = max(1, int((0.35e-6 * 5.0e13 / (8.0 * H * W * Wh)) ** 0.5))
        nb = min(waste_cap, pl.cdiv(N, S))
        # Cap 2 (VMEM): keep blocks + temporaries well inside scoped VMEM.
        while nb > 1 and _est_vmem_bytes(H, W, Wh, nb) > 24 * 2 ** 20:
            nb = max(1, nb // 2)
    nb = int(max(1, nb))

    if S == 1 and nb >= N:
        nb = N                            # single block: block == full array
    else:
        lane_align = 128 // math.gcd(W, 128)   # make nb*W a multiple of 128
        nb = _round_up(nb, lane_align)

    G = pl.cdiv(N, S * nb)                # accumulation ("arbitrary") axis
    n_pad = S * G * nb

    pred_f = pred.reshape(N, H, W).astype(jnp.float32)
    targ_f = target.reshape(N, H, W).astype(jnp.float32)
    if n_pad != N:                        # zero images contribute 0 to the sum
        zeros = jnp.zeros((n_pad - N, H, W), jnp.float32)
        pred_f = jnp.concatenate([pred_f, zeros], axis=0)
        targ_f = jnp.concatenate([targ_f, zeros], axis=0)

    # Lane-major layout (rows = H, lanes = (image, W)).  One XLA transpose in the
    # wrapper keeps every in-kernel op a plain lane-dense 2D matmul / aligned slice.
    pred_t = jnp.transpose(pred_f, (1, 0, 2)).reshape(H, n_pad * W)
    targ_t = jnp.transpose(targ_f, (1, 0, 2)).reshape(H, n_pad * W)

    # Constant DFT operands (fetched once; constant index_map keeps them resident).
    fhr, fhi = _dft_matrices(H, H)                    # (H, H)
    fwr, fwi = _dft_matrices(W, Wh)                   # (W, Wh)
    colw = np.full((Wh,), 2.0, np.float32)            # Hermitian column weights
    colw[0] = 1.0
    if W % 2 == 0:
        colw[-1] = 1.0
    fh = jnp.asarray(np.concatenate([fhr, fhi], axis=0))        # (2H, H)

    q = nb * Wh
    qp = _round_up(q, 128)                # lane-dense accumulator width
    fwbd_np = np.zeros((nb * W, 2 * qp), np.float32)
    for b in range(nb):
        fwbd_np[b * W:(b + 1) * W, b * Wh:(b + 1) * Wh] = fwr * colw
        fwbd_np[b * W:(b + 1) * W, qp + b * Wh:qp + (b + 1) * Wh] = fwi * colw
    fwbd = jnp.asarray(fwbd_np)

    x_spec = pl.BlockSpec((H, nb * W), lambda s, g: (0, s * G + g))
    fh_spec = pl.BlockSpec((2 * H, H), lambda s, g: (0, 0))
    fwbd_spec = pl.BlockSpec((nb * W, 2 * qp), lambda s, g: (0, 0))
    out_spec = pl.BlockSpec((1, H, qp), lambda s, g: (s, 0, 0))

    flops = (8 * H * H * W * n_pad               # stage A (pred + target)
             + 16 * H * W * qp * n_pad           # stage B (block-diagonal)
             + 12 * H * qp * n_pad // max(nb, 1))  # elementwise epilogue
    transcendentals = 2 * n_pad * H * Wh         # sqrt
    bytes_accessed = (2 * n_pad * H * W * 4
                      + (2 * H * H + nb * W * 2 * qp) * 4
                      + S * H * qp * 4)

    est = _est_vmem_bytes(H, W, Wh, nb)
    vmem_limit = int(min(48 * 2 ** 20, max(16 * 2 ** 20, 2 * est)))

    partials = pl.pallas_call(
        _freq_loss_kernel,
        out_shape=jax.ShapeDtypeStruct((S, H, qp), jnp.float32),
        grid_spec=pltpu.PrefetchScalarGridSpec(
            num_scalar_prefetch=0,
            grid=(S, G),
            in_specs=[x_spec, x_spec, fh_spec, fwbd_spec],
            out_specs=out_spec,
        ),
        compiler_params=pltpu.CompilerParams(
            dimension_semantics=("parallel", "arbitrary"),
            vmem_limit_bytes=vmem_limit),
        cost_estimate=pl.CostEstimate(
            flops=int(flops),
            transcendentals=int(transcendentals),
            bytes_accessed=int(bytes_accessed)),
    )(pred_t, targ_t, fh, fwbd)

    # Hermitian column weights already folded into F_W; padded columns and padded
    # images contribute exactly zero.  Final reduce + mean (over the *un-padded*
    # full spectrum, N*H*W elements) in plain JAX.
    return jnp.sum(partials) / jnp.float32(N * H * W)


def frequency_loss_ref(pred, target):
    """Pure-JAX reference matching the PyTorch module."""
    pf = jnp.fft.fft2(pred.astype(jnp.float32), norm="ortho")
    tf = jnp.fft.fft2(target.astype(jnp.float32), norm="ortho")
    return jnp.mean(jnp.abs(jnp.abs(pf) - jnp.abs(tf)))


if __name__ == "__main__":
    key = jax.random.PRNGKey(0)
    k1, k2 = jax.random.split(key)
    B, C, H, W = 2, 4, 16, 16
    pred = jax.random.normal(k1, (B, C, H, W), dtype=jnp.float32)
    target = jax.random.normal(k2, (B, C, H, W), dtype=jnp.float32)

    loss = jax.block_until_ready(frequency_loss(pred, target))
    ref = jax.block_until_ready(frequency_loss_ref(pred, target))
    assert np.allclose(np.asarray(loss), np.asarray(ref), rtol=1e-4, atol=1e-4), \
        (float(loss), float(ref))

    print("KERNEL_OK")
</pallas_src>

<mosaic_0001>
module attributes {stable_mosaic.version = 11 : i64} {
  func.func @_freq_loss_kernel(%arg0: i32, %arg1: i32, %arg2: memref<16x128xf32, #tpu.memory_space<vmem>>, %arg3: memref<16x128xf32, #tpu.memory_space<vmem>>, %arg4: memref<32x16xf32, #tpu.memory_space<vmem>>, %arg5: memref<128x256xf32, #tpu.memory_space<vmem>>, %arg6: memref<1x16x128xf32, #tpu.memory_space<vmem>>) attributes {dimension_semantics = [#tpu.dimension_semantics<parallel>, #tpu.dimension_semantics<arbitrary>], iteration_bounds = array<i64: 1, 1>, scalar_prefetch = 0 : i64, scratch_operands = 0 : i64, tpu.core_type = #tpu.core_type<tc>, window_params = [{transform_indices = @transform_0, window_bounds = array<i64: 16, 128>}, {transform_indices = @transform_1, window_bounds = array<i64: 16, 128>}, {pipeline_mode = #tpu.pipeline_mode<synchronous>, transform_indices = @transform_2, window_bounds = array<i64: 32, 16>}, {pipeline_mode = #tpu.pipeline_mode<synchronous>, transform_indices = @transform_3, window_bounds = array<i64: 128, 256>}, {transform_indices = @transform_4, window_bounds = array<i64: 1, 16, 128>}]} {
    %c0_i32 = arith.constant 0 : i32
    %0 = arith.cmpi eq, %arg1, %c0_i32 : i32
    %1 = arith.extui %0 : i1 to i32
    %c0_i32_0 = arith.constant 0 : i32
    %2 = arith.cmpi ne, %1, %c0_i32_0 : i32
    scf.if %2 {
      %cst_21 = arith.constant 0.000000e+00 : f32
      %39 = vector.broadcast %cst_21 : f32 to vector<1x16x128xf32>
      %c0_22 = arith.constant 0 : index
      %c0_23 = arith.constant 0 : index
      %c0_24 = arith.constant 0 : index
      %40 = vector.load %arg6[%c0_22, %c0_23, %c0_24] : memref<1x16x128xf32, #tpu.memory_space<vmem>>, vector<1x16x128xf32>
      tpu.vector_store %arg6[%c0_22, %c0_23, %c0_24], %39 {strides = array<i32>} : memref<1x16x128xf32, #tpu.memory_space<vmem>>, vector<1x16x128xf32>,
    } else {
    }
    %c0 = arith.constant 0 : index
    %c0_1 = arith.constant 0 : index
    %3 = vector.load %arg4[%c0, %c0_1] : memref<32x16xf32, #tpu.memory_space<vmem>>, vector<32x16xf32>
    %c0_2 = arith.constant 0 : index
    %c0_3 = arith.constant 0 : index
    %4 = vector.load %arg2[%c0_2, %c0_3] : memref<16x128xf32, #tpu.memory_space<vmem>>, vector<16x128xf32>
    %cst = arith.constant dense<0.000000e+00> : vector<32x128xf32>
    %5 = tpu.matmul %3, %4, %cst {dimension_numbers = #tpu.dot_dimension_numbers<[1], [0], [0], [1], [0, 0, 1, 1], [], []>} : vector<32x16xf32>, vector<16x128xf32>, vector<32x128xf32> -> vector<32x128xf32>
    %c0_4 = arith.constant 0 : index
    %c0_5 = arith.constant 0 : index
    %6 = vector.load %arg5[%c0_4, %c0_5] : memref<128x256xf32, #tpu.memory_space<vmem>>, vector<128x256xf32>
    %cst_6 = arith.constant dense<0.000000e+00> : vector<32x256xf32>
    %7 = tpu.matmul %5, %6, %cst_6 {dimension_numbers = #tpu.dot_dimension_numbers<[1], [0], [0], [1], [0, 0, 1, 1], [], []>} : vector<32x128xf32>, vector<128x256xf32>, vector<32x256xf32> -> vector<32x256xf32>
    %8 = vector.extract_strided_slice %7 {offsets = [0, 0], sizes = [16, 128], strides = [1, 1]} : vector<32x256xf32> to vector<16x128xf32>
    %9 = vector.extract_strided_slice %7 {offsets = [16, 128], sizes = [16, 128], strides = [1, 1]} : vector<32x256xf32> to vector<16x128xf32>
    %10 = arith.subf %8, %9 : vector<16x128xf32>
    %11 = vector.extract_strided_slice %7 {offsets = [0, 128], sizes = [16, 128], strides = [1, 1]} : vector<32x256xf32> to vector<16x128xf32>
    %12 = vector.extract_strided_slice %7 {offsets = [16, 0], sizes = [16, 128], strides = [1, 1]} : vector<32x256xf32> to vector<16x128xf32>
    %13 = arith.addf %11, %12 : vector<16x128xf32>
    %14 = arith.mulf %10, %10 : vector<16x128xf32>
    %15 = arith.mulf %13, %13 : vector<16x128xf32>
    %16 = arith.addf %14, %15 : vector<16x128xf32>
    %17 = math.sqrt %16 : vector<16x128xf32>
    %c0_7 = arith.constant 0 : index
    %c0_8 = arith.constant 0 : index
    %18 = vector.load %arg4[%c0_7, %c0_8] : memref<32x16xf32, #tpu.memory_space<vmem>>, vector<32x16xf32>
    %c0_9 = arith.constant 0 : index
    %c0_10 = arith.constant 0 : index
    %19 = vector.load %arg3[%c0_9, %c0_10] : memref<16x128xf32, #tpu.memory_space<vmem>>, vector<16x128xf32>
    %cst_11 = arith.constant dense<0.000000e+00> : vector<32x128xf32>
    %20 = tpu.matmul %18, %19, %cst_11 {dimension_numbers = #tpu.dot_dimension_numbers<[1], [0], [0], [1], [0, 0, 1, 1], [], []>} : vector<32x16xf32>, vector<16x128xf32>, vector<32x128xf32> -> vector<32x128xf32>
    %c0_12 = arith.constant 0 : index
    %c0_13 = arith.constant 0 : index
    %21 = vector.load %arg5[%c0_12, %c0_13] : memref<128x256xf32, #tpu.memory_space<vmem>>, vector<128x256xf32>
    %cst_14 = arith.constant dense<0.000000e+00> : vector<32x256xf32>
    %22 = tpu.matmul %20, %21, %cst_14 {dimension_numbers = #tpu.dot_dimension_numbers<[1], [0], [0], [1], [0, 0, 1, 1], [], []>} : vector<32x128xf32>, vector<128x256xf32>, vector<32x256xf32> -> vector<32x256xf32>
    %23 = vector.extract_strided_slice %22 {offsets = [0, 0], sizes = [16, 128], strides = [1, 1]} : vector<32x256xf32> to vector<16x128xf32>
    %24 = vector.extract_strided_slice %22 {offsets = [16, 128], sizes = [16, 128], strides = [1, 1]} : vector<32x256xf32> to vector<16x128xf32>
    %25 = arith.subf %23, %24 : vector<16x128xf32>
    %26 = vector.extract_strided_slice %22 {offsets = [0, 128], sizes = [16, 128], strides = [1, 1]} : vector<32x256xf32> to vector<16x128xf32>
    %27 = vector.extract_strided_slice %22 {offsets = [16, 0], sizes = [16, 128], strides = [1, 1]} : vector<32x256xf32> to vector<16x128xf32>
    %28 = arith.addf %26, %27 : vector<16x128xf32>
    %29 = arith.mulf %25, %25 : vector<16x128xf32>
    %30 = arith.mulf %28, %28 : vector<16x128xf32>
    %31 = arith.addf %29, %30 : vector<16x128xf32>
    %32 = math.sqrt %31 : vector<16x128xf32>
    %33 = arith.subf %17, %32 : vector<16x128xf32>
    %34 = math.absf %33 : vector<16x128xf32>
    %c0_15 = arith.constant 0 : index
    %c0_16 = arith.constant 0 : index
    %c0_17 = arith.constant 0 : index
    %35 = vector.load %arg6[%c0_15, %c0_16, %c0_17] : memref<1x16x128xf32, #tpu.memory_space<vmem>>, vector<1x16x128xf32>
    %36 = vector.shape_cast %34 : vector<16x128xf32> to vector<1x16x128xf32>
    %37 = arith.addf %35, %36 : vector<1x16x128xf32>
    %c0_18 = arith.constant 0 : index
    %c0_19 = arith.constant 0 : index
    %c0_20 = arith.constant 0 : index
    %38 = vector.load %arg6[%c0_18, %c0_19, %c0_20] : memref<1x16x128xf32, #tpu.memory_space<vmem>>, vector<1x16x128xf32>
    tpu.vector_store %arg6[%c0_18, %c0_19, %c0_20], %37 {strides = array<i32>} : memref<1x16x128xf32, #tpu.memory_space<vmem>>, vector<1x16x128xf32>,
    return
  }
  func.func @transform_0(%arg0: i32, %arg1: i32) -> (i32, i32) {
    %c1_i32 = arith.constant 1 : i32
    %0 = arith.muli %arg0, %c1_i32 : i32
    %1 = arith.addi %0, %arg1 : i32
    %c0_i32 = arith.constant 0 : i32
    %c0_i32_0 = arith.constant 0 : i32
    return %c0_i32, %1 : i32, i32
  }
  func.func @transform_1(%arg0: i32, %arg1: i32) -> (i32, i32) {
    %c1_i32 = arith.constant 1 : i32
    %0 = arith.muli %arg0, %c1_i32 : i32
    %1 = arith.addi %0, %arg1 : i32
    %c0_i32 = arith.constant 0 : i32
    %c0_i32_0 = arith.constant 0 : i32
    return %c0_i32, %1 : i32, i32
  }
  func.func @transform_2(%arg0: i32, %arg1: i32) -> (i32, i32) {
    %c0_i32 = arith.constant 0 : i32
    %c0_i32_0 = arith.constant 0 : i32
    %c0_i32_1 = arith.constant 0 : i32
    return %c0_i32, %c0_i32_0 : i32, i32
  }
  func.func @transform_3(%arg0: i32, %arg1: i32) -> (i32, i32) {
    %c0_i32 = arith.constant 0 : i32
    %c0_i32_0 = arith.constant 0 : i32
    %c0_i32_1 = arith.constant 0 : i32
    return %c0_i32, %c0_i32_0 : i32, i32
  }
  func.func @transform_4(%arg0: i32, %arg1: i32) -> (i32, i32, i32) {
    %c0_i32 = arith.constant 0 : i32
    %c0_i32_0 = arith.constant 0 : i32
    %c0_i32_1 = arith.constant 0 : i32
    return %arg0, %c0_i32, %c0_i32_0 : i32, i32, i32
  }
}

</mosaic_0001>

<bundles_post_ra>
// kernel: tpu_custom_call.1
= control target key start
LH: loop header
LB: loop body
LE: loop exit
PB: predicated region body
PF: predicated region fallthrough
CT: control target
= control target key end

     0   :  { %9 = vsyncpa [#allocation3], 0  ;;  %s554_s0 = inlined_call_operand.vmem [shape: f32[16,128], index: 0, kind: input, shape index: {}]   ;;  %s555_s1 = inlined_call_operand.vmem [shape: f32[16,128], index: 1, kind: input, shape index: {}]   ;;  %s556_s2 = inlined_call_operand.vmem [shape: f32[32,16], index: 2, kind: input, shape index: {}]   ;;  %s557_s3 = inlined_call_operand.hbm [shape: f32[128,256], index: 3, kind: input, shape index: {}]   ;;  %s558_s4 = inlined_call_operand.hbm [shape: f32[1,16,128], index: 4, kind: output, shape index: {}]  }
   0x1   :  { %10 = vsyncpa [#allocation4], 0  ;;  %s33_s17 = sshll.u32 %s557_s3, 4  ;;  %s485_s18 = smov [#allocation2]   ;;  %s34_s17 = int_to_ptr.hbm [resolvable:$true] %s33_s17 }
   0x2   :  { %s35_s19 = sshll.u32 %s485_s18, 4  ;;  %s486_s20 = smov 256   ;;  %s36_s19 = int_to_ptr.vmem [resolvable:$true] %s35_s19 }
   0x3   :  { %s487_s21 = smov 16  }
   0x4   :  { %41 = dma.hbm_to_vmem [thread:$0]  %s34_s17, 4096, %s36_s19, [#allocation3], %s486_s20, %s486_s20, %s487_s21  }
   0x5   :  { %481 = dma.done.wait [#allocation3], 4096  }
   0x6   :  { %482 = vsyncadd [#allocation3], 4294963200  ;;  %v79_v0 = vld [vmem:[%s554_s0 + $0x8] sm:$0xff]  ;;  %v78_v2 = vld [vmem:[%s554_s0] sm:$0xff]  ;;  %vm80_vm0 = vcmask 130048   ;;  %s385_s12 = sshll.u32 %s558_s4, 4  ;;  %s386_s12 = int_to_ptr.hbm [resolvable:$true] %s385_s12 }
   0x7   :  { %v247_v1 = vld [vmem:[%s555_s1 + $0x8] sm:$0xff]  ;;  %107 = vmatpush.msra.mxu0 %v79_v0  ;;  %v246_v3 = vld [vmem:[%s555_s1] sm:$0xff]  ;;  %v152_v5 = vld [vmem:[#allocation2 + $0xf0] sm:$0xff]  ;;  %s489_s13 = smov 128   ;;  %s490_s14 = smov 8  }
   0x8   :  { %262 = vmatpush.msra.mxu3 %v247_v1  ;;  %v74_v4 = vld [vmem:[%s556_s2] sm:$0xff]  ;;  %v153_v6 = vld [vmem:[#allocation2 + $0xf8] sm:$0xff]  ;;  %v151_v8 = vld [vmem:[#allocation2 + $0xe8] sm:$0xff]  ;;  %154 = vmatpush.msra.mxu1 %v152_v5 }
   0x9   :  { %108 = vmatpush.msra.mxu0 %v78_v2  ;;  %v150_v7 = vld [vmem:[#allocation2 + $0xe0] sm:$0xff]  ;;  %183 = vmatpush.msra.mxu2 %v153_v6  ;;  %v148_v9 = vld [vmem:[#allocation2 + $0xd0] sm:$0xff]  ;;  %v149_v10 = vld [vmem:[#allocation2 + $0xd8] sm:$0xff] }
   0xa   :  { %263 = vmatpush.msra.mxu3 %v246_v3  ;;  %410 = vmatmul.msk.f32.vlgmr.msra.gmra.mxu0 %vm80_vm0, %v74_v4  ;;  %v146_v11 = vld [vmem:[#allocation2 + $0xc0] sm:$0xff]  ;;  %v147_v12 = vld [vmem:[#allocation2 + $0xc8] sm:$0xff]  ;;  %v144_v14 = vld [vmem:[#allocation2 + $0xb0] sm:$0xff] }
   0xb   :  { %414 = vmatmul.msk.f32.vlgmr.msra.gmra.mxu3 %vm80_vm0, %v74_v4  ;;  %277 = vmatpush.msrb.mxu0 %v152_v5  ;;  %v75_v13 = vld [vmem:[%s556_s2 + $0x8] sm:$0xff]  ;;  %v145_v15 = vld [vmem:[#allocation2 + $0xb8] sm:$0xff]  ;;  %v142_v16 = vld [vmem:[#allocation2 + $0xa0] sm:$0xff] }
   0xc   :  { %306 = vmatpush.msrb.mxu3 %v153_v6  ;;  %155 = vmatpush.msra.mxu1 %v150_v7  ;;  %v143_v17 = vld [vmem:[#allocation2 + $0xa8] sm:$0xff]  ;;  %v140_v18 = vld [vmem:[#allocation2 + $0x90] sm:$0xff]  ;;  %v141_v19 = vld [vmem:[#allocation2 + $0x98] sm:$0xff] }
   0xd   :  { %184 = vmatpush.msra.mxu2 %v151_v8  ;;  %278 = vmatpush.msrb.mxu0 %v150_v7  ;;  %v138_v20 = vld [vmem:[#allocation2 + $0x80] sm:$0xff]  ;;  %v139_v21 = vld [vmem:[#allocation2 + $0x88] sm:$0xff]  ;;  %v76_v22 = vld [vmem:[%s556_s2 + $0x10] sm:$0xff] }
   0xe   :  { %307 = vmatpush.msrb.mxu3 %v151_v8  ;;  %156 = vmatpush.msra.mxu1 %v148_v9  ;;  %v136_v23 = vld [vmem:[#allocation2 + $0x70] sm:$0xff]  ;;  %v137_v24 = vld [vmem:[#allocation2 + $0x78] sm:$0xff]  ;;  %v134_v25 = vld [vmem:[#allocation2 + $0x60] sm:$0xff] }
   0xf   :  { %185 = vmatpush.msra.mxu2 %v149_v10  ;;  %279 = vmatpush.msrb.mxu0 %v148_v9  ;;  %v135_v26 = vld [vmem:[#allocation2 + $0x68] sm:$0xff]  ;;  %v132_v27 = vld [vmem:[#allocation2 + $0x50] sm:$0xff]  ;;  %v133_v28 = vld [vmem:[#allocation2 + $0x58] sm:$0xff] }
  0x10   :  { %308 = vmatpush.msrb.mxu3 %v149_v10  ;;  %157 = vmatpush.msra.mxu1 %v146_v11  ;;  %v130_v29 = vld [vmem:[#allocation2 + $0x40] sm:$0xff]  ;;  %v131_v30 = vld [vmem:[#allocation2 + $0x48] sm:$0xff]  ;;  %v77_v31 = vld [vmem:[%s556_s2 + $0x18] sm:$0xff]  ;;  %s488_s2 = smov [#allocation5]  }
  0x11   :  { %186 = vmatpush.msra.mxu2 %v147_v12  ;;  %280 = vmatpush.msrb.mxu0 %v146_v11  ;;  %v128_v32 = vld [vmem:[#allocation2 + $0x30] sm:$0xff]  ;;  %v129_v33 = vld [vmem:[#allocation2 + $0x38] sm:$0xff]  ;;  %v126_v34 = vld [vmem:[#allocation2 + $0x20] sm:$0xff]  ;;  %s383_s9 = sshll.u32 %s488_s2, 4  ;;  %s384_s9 = int_to_ptr.vmem [resolvable:$true] %s383_s9 }
  0x12   :  { %411 = vmatmul.msk.f32.gmra.mxu0 %vm80_vm0, %v75_v13  ;;  %158 = vmatpush.msra.mxu1 %v144_v14  ;;  %v127_v35 = vld [vmem:[#allocation2 + $0x28] sm:$0xff]  ;;  %v124_v36 = vld [vmem:[#allocation2 + $0x10] sm:$0xff]  ;;  %v125_v37 = vld [vmem:[#allocation2 + $0x18] sm:$0xff] }
  0x13   :  { %415 = vmatmul.msk.f32.gmra.mxu3 %vm80_vm0, %v75_v13  ;;  %187 = vmatpush.msra.mxu2 %v145_v15  ;;  %v122_v38 = vld [vmem:[#allocation2] sm:$0xff]  ;;  %v123_v39 = vld [vmem:[#allocation2 + $0x8] sm:$0xff] }
  0x14   :  { %309 = vmatpush.msrb.mxu3 %v147_v12  ;;  %159 = vmatpush.msra.mxu1 %v142_v16 }
  0x15   :  { %188 = vmatpush.msra.mxu2 %v143_v17  ;;  %281 = vmatpush.msrb.mxu0 %v144_v14 }
  0x16   :  { %310 = vmatpush.msrb.mxu3 %v145_v15  ;;  %160 = vmatpush.msra.mxu1 %v140_v18 }
  0x17   :  { %189 = vmatpush.msra.mxu2 %v141_v19  ;;  %282 = vmatpush.msrb.mxu0 %v142_v16 }
  0x18   :  { %311 = vmatpush.msrb.mxu3 %v143_v17  ;;  %161 = vmatpush.msra.mxu1 %v138_v20 }
  0x19   :  { %190 = vmatpush.msra.mxu2 %v139_v21  ;;  %283 = vmatpush.msrb.mxu0 %v140_v18 }
  0x1a   :  { %412 = vmatmul.msk.f32.gmra.mxu0 %vm80_vm0, %v76_v22  ;;  %162 = vmatpush.msra.mxu1 %v136_v23 }
  0x1b   :  { %416 = vmatmul.msk.f32.gmra.mxu3 %vm80_vm0, %v76_v22  ;;  %191 = vmatpush.msra.mxu2 %v137_v24 }
  0x1c   :  { %312 = vmatpush.msrb.mxu3 %v141_v19  ;;  %163 = vmatpush.msra.mxu1 %v134_v25 }
  0x1d   :  { %192 = vmatpush.msra.mxu2 %v135_v26  ;;  %284 = vmatpush.msrb.mxu0 %v138_v20 }
  0x1e   :  { %313 = vmatpush.msrb.mxu3 %v139_v21  ;;  %164 = vmatpush.msra.mxu1 %v132_v27 }
  0x1f   :  { %193 = vmatpush.msra.mxu2 %v133_v28  ;;  %285 = vmatpush.msrb.mxu0 %v136_v23 }
  0x20   :  { %314 = vmatpush.msrb.mxu3 %v137_v24  ;;  %165 = vmatpush.msra.mxu1 %v130_v29 }
  0x21   :  { %194 = vmatpush.msra.mxu2 %v131_v30  ;;  %286 = vmatpush.msrb.mxu0 %v134_v25 }
  0x22   :  { %413 = vmatmul.msk.f32.gmra.mxu0 %vm80_vm0, %v77_v31  ;;  %315 = vmatpush.msrb.mxu3 %v135_v26 }
  0x23   :  { %417 = vmatmul.msk.f32.gmra.mxu3 %vm80_vm0, %v77_v31  ;;  %166 = vmatpush.msra.mxu1 %v128_v32 }
  0x24   :  { %195 = vmatpush.msra.mxu2 %v129_v33  ;;  %316 = vmatpush.msrb.mxu3 %v133_v28 }
  0x25   :  { %167 = vmatpush.msra.mxu1 %v126_v34  ;;  %287 = vmatpush.msrb.mxu0 %v132_v27 }
  0x26   :  { %196 = vmatpush.msra.mxu2 %v127_v35  ;;  %317 = vmatpush.msrb.mxu3 %v131_v30 }
  0x27   :  { %168 = vmatpush.msra.mxu1 %v124_v36  ;;  %288 = vmatpush.msrb.mxu0 %v130_v29 }
  0x28   :  { %197 = vmatpush.msra.mxu2 %v125_v37  ;;  %318 = vmatpush.msrb.mxu3 %v129_v33 }
  0x29   :  { %289 = vmatpush.msrb.mxu0 %v128_v32  ;;  %169 = vmatpush.msra.mxu1 %v122_v38 }
  0x2a   :  { %319 = vmatpush.msrb.mxu3 %v127_v35  ;;  %198 = vmatpush.msra.mxu2 %v123_v39 }
  0x2b   :  { %290 = vmatpush.msrb.mxu0 %v126_v34 }
  0x2c   :  { %320 = vmatpush.msrb.mxu3 %v125_v37 }
  0x2d   :  { %291 = vmatpush.msrb.mxu0 %v124_v36 }
  0x2e   :  { %321 = vmatpush.msrb.mxu3 %v123_v39 }
  0x2f   :  { %292 = vmatpush.msrb.mxu0 %v122_v38 }
  0x87   :  { %v110_v40 = vpop.f32.mrf.mxu0 }
  0x88   :  { %170 = vmatmul.f32.vlgmr.msra.gmra.mxu1 %v110_v40  ;;  %199 = vmatmul.f32.vlgmr.msra.gmra.mxu2 %v110_v40 }
  0x8e   :  { %v265_v41 = vpop.f32.mrf.mxu3 }
  0x8f   :  { %293 = vmatmul.f32.vlgmr.msrb.gmra.mxu0 %v265_v41  ;;  %322 = vmatmul.f32.vlgmr.msrb.gmra.mxu3 %v265_v41  ;;  %v113_v42 = vpop.f32.mrf.mxu0 }
  0x90   :  { %173 = vmatmul.f32.gmra.mxu1 %v113_v42  ;;  %202 = vmatmul.f32.gmra.mxu2 %v113_v42 }
  0x96   :  { %v268_v43 = vpop.f32.mrf.mxu3 }
  0x97   :  { %296 = vmatmul.f32.gmra.mxu0 %v268_v43  ;;  %325 = vmatmul.f32.gmra.mxu3 %v268_v43  ;;  %v116_v44 = vpop.f32.mrf.mxu0 }
  0x98   :  { %176 = vmatmul.f32.gmra.mxu1 %v116_v44  ;;  %205 = vmatmul.f32.gmra.mxu2 %v116_v44 }
  0x9e   :  { %v271_v45 = vpop.f32.mrf.mxu3 }
  0x9f   :  { %299 = vmatmul.f32.gmra.mxu0 %v271_v45  ;;  %328 = vmatmul.f32.gmra.mxu3 %v271_v45  ;;  %v119_v46 = vpop.f32.mrf.mxu0 }
  0xa0   :  { %179 = vmatmul.f32.gmra.mxu1 %v119_v46  ;;  %208 = vmatmul.f32.gmra.mxu2 %v119_v46 }
  0xa6   :  { %v274_v47 = vpop.f32.mrf.mxu3 }
  0xa7   :  { %302 = vmatmul.f32.gmra.mxu0 %v274_v47  ;;  %331 = vmatmul.f32.gmra.mxu3 %v274_v47 }
 0x105   :  { %v171_v48 = vpop.f32.mrf.mxu1 }
 0x10b   :  { %v200_v49 = vpop.f32.mrf.mxu2 }
 0x10c   :  { %v294_v50 = vpop.f32.mrf.mxu0 }
 0x10d   :  { %v174_v51 = vpop.f32.mrf.mxu1 }
 0x112   :  { %v323_v52 = vpop.f32.mrf.mxu3 }
 0x113   :  { %v203_v53 = vpop.f32.mrf.mxu2 }
 0x114   :  { %v297_v54 = vpop.f32.mrf.mxu0 }
 0x115   :  { %v177_v55 = vpop.f32.mrf.mxu1 }
 0x116   :  { %v214_v57 = vadd.f32 %v200_v49, %v177_v55 }
 0x118   :  { %v218_v61 = vmul.f32 %v214_v57, %v214_v57 }
 0x11a   :  { %v326_v56 = vpop.f32.mrf.mxu3 }
 0x11b   :  { %v206_v58 = vpop.f32.mrf.mxu2 }
 0x11c   :  { %v300_v59 = vpop.f32.mrf.mxu0  ;;  %v212_v60 = vsub.f32 %v171_v48, %v206_v58 }
 0x11d   :  { %v180_v63 = vpop.f32.mrf.mxu1  ;;  %v337_v1 = vadd.f32 %v323_v52, %v300_v59 }
 0x11e   :  { %v216_v62 = vmul.f32 %v212_v60, %v212_v60  ;;  %v215_v3 = vadd.f32 %v203_v53, %v180_v63 }
 0x11f   :  { %v341_v6 = vmul.f32 %v337_v1, %v337_v1 }
 0x120   :  { %v220_v0 = vadd.f32 %v218_v61, %v216_v62  ;;  %v219_v10 = vmul.f32 %v215_v3, %v215_v3 }
 0x122   :  { %v329_v2 = vpop.f32.mrf.mxu3  ;;  %425 = vrsqrt.f32 %v220_v0  ;;  %vm229_vm1 = vcmp.eq.f32.partialorder %v220_v0, inf  ;;  %v232_v44 = vand.u32 2147483648, %v220_v0  ;;  %vm231_vm3 = vcmp.eq.f32.partialorder %v220_v0, 0.0 }
 0x123   :  { %v335_v4 = vsub.f32 %v294_v50, %v329_v2  ;;  %v209_v5 = vpop.f32.mrf.mxu2 }
 0x124   :  { %v213_v8 = vsub.f32 %v174_v51, %v209_v5  ;;  %v303_v9 = vpop.f32.mrf.mxu0 }
 0x125   :  { %v339_v7 = vmul.f32 %v335_v4, %v335_v4  ;;  %v338_v15 = vadd.f32 %v326_v56, %v303_v9 }
 0x126   :  { %v217_v12 = vmul.f32 %v213_v8, %v213_v8 }
 0x127   :  { %v343_v11 = vadd.f32 %v341_v6, %v339_v7  ;;  %v342_v20 = vmul.f32 %v338_v15, %v338_v15 }
 0x128   :  { %v426_v13 = vpop.eup %425  ;;  %v221_v14 = vadd.f32 %v219_v10, %v217_v12 }
 0x129   :  { %427 = vrsqrt.f32 %v343_v11  ;;  %v223_v16 = vmul.f32 %v426_v13, %v220_v0  ;;  %vm352_vm2 = vcmp.eq.f32.partialorder %v343_v11, inf  ;;  %v355_v45 = vand.u32 2147483648, %v343_v11 }
 0x12a   :  { %v332_v17 = vpop.f32.mrf.mxu3  ;;  %429 = vrsqrt.f32 %v221_v14  ;;  %vm354_vm4 = vcmp.eq.f32.partialorder %v343_v11, 0.0  ;;  %vm241_vm5 = vcmp.eq.f32.partialorder %v221_v14, inf  ;;  %v244_v57 = vand.u32 2147483648, %v221_v14 }
 0x12b   :  { %v336_v18 = vsub.f32 %v297_v54, %v332_v17  ;;  %v224_v19 = vmul.f32 %v426_v13, %v223_v16  ;;  %vm243_vm7 = vcmp.eq.f32.partialorder %v221_v14, 0.0 }
 0x12d   :  { %v340_v21 = vmul.f32 %v336_v18, %v336_v18  ;;  %v225_v22 = vmul.f32 0.5, %v224_v19 }
 0x12f   :  { %v428_v23 = vpop.eup %427  ;;  %v344_v24 = vadd.f32 %v342_v20, %v340_v21  ;;  %v226_v25 = vsub.f32 1.5, %v225_v22 }
 0x130   :  { %v346_v26 = vmul.f32 %v428_v23, %v343_v11  ;;  %v430_v27 = vpop.eup %429 }
 0x131   :  { %431 = vrsqrt.f32 %v344_v24  ;;  %v235_v29 = vmul.f32 %v430_v27, %v221_v14  ;;  %v227_v30 = vmul.f32 %v426_v13, %v226_v25  ;;  %vm364_vm6 = vcmp.eq.f32.partialorder %v344_v24, inf }
 0x132   :  { %v347_v28 = vmul.f32 %v428_v23, %v346_v26  ;;  %v367_v58 = vand.u32 2147483648, %v344_v24  ;;  %vm366_vm8 = vcmp.eq.f32.partialorder %v344_v24, 0.0 }
 0x133   :  { %v236_v32 = vmul.f32 %v430_v27, %v235_v29  ;;  %v228_v35 = vmul.f32 %v227_v30, %v220_v0 }
 0x134   :  { %v348_v31 = vmul.f32 0.5, %v347_v28 }
 0x135   :  { %v237_v34 = vmul.f32 0.5, %v236_v32  ;;  %v230_v41 = vsel %vm229_vm1, %v220_v0, %v228_v35 }
 0x136   :  { %v349_v33 = vsub.f32 1.5, %v348_v31  ;;  %v233_v48 = vsel %vm231_vm3, %v232_v44, %v230_v41 }
 0x137   :  { %v432_v36 = vpop.eup %431  ;;  %v238_v37 = vsub.f32 1.5, %v237_v34 }
 0x138   :  { %v358_v38 = vmul.f32 %v432_v36, %v344_v24  ;;  %v350_v39 = vmul.f32 %v428_v23, %v349_v33 }
 0x139   :  { %v239_v42 = vmul.f32 %v430_v27, %v238_v37 }
 0x13a   :  { %v359_v40 = vmul.f32 %v432_v36, %v358_v38  ;;  %v351_v43 = vmul.f32 %v350_v39, %v343_v11 }
 0x13b   :  { %v240_v51 = vmul.f32 %v239_v42, %v221_v14 }
 0x13c   :  { %v360_v46 = vmul.f32 0.5, %v359_v40  ;;  %v353_v47 = vsel %vm352_vm2, %v343_v11, %v351_v43 }
 0x13d   :  { %v356_v49 = vsel %vm354_vm4, %v355_v45, %v353_v47  ;;  %v242_v55 = vsel %vm241_vm5, %v221_v14, %v240_v51 }
 0x13e   :  { %v361_v50 = vsub.f32 1.5, %v360_v46  ;;  %v369_v52 = vsub.f32 %v233_v48, %v356_v49  ;;  %v245_v60 = vsel %vm243_vm7, %v244_v57, %v242_v55 }
 0x140   :  { %v362_v53 = vmul.f32 %v432_v36, %v361_v50  ;;  %v371_v54 = vand.u32 2147483647, %v369_v52 }
 0x142   :  { %v363_v56 = vmul.f32 %v362_v53, %v344_v24  ;;  %377 = vst [vmem:[#allocation5] sm:$0xff] %v371_v54 }
 0x144   :  { %v365_v59 = vsel %vm364_vm6, %v344_v24, %v363_v56 }
 0x145   :  { %v368_v61 = vsel %vm366_vm8, %v367_v58, %v365_v59 }
 0x146   :  { %v370_v62 = vsub.f32 %v245_v60, %v368_v61 }
 0x148   :  { %v372_v63 = vand.u32 2147483647, %v370_v62 }
 0x14a   :  { %378 = vst [vmem:[#allocation5 + $0x8] sm:$0xff] %v372_v63 }
 0x14b   :  { %391 = dma.vmem_to_hbm [thread:$0]  %s384_s9, 256, %s386_s12, [#allocation4], %s489_s13, %s489_s13, %s490_s14  }
 0x14c   :  { %483 = dma.done.wait [#allocation4], 256  }
 0x14d   :  { %484 = vsyncadd [#allocation4], 4294967040 }
 0x14e   :  { %396 = vsyncpa [#allocation3], 1 }
 0x14f   :  { %397 = vsyncpa [#allocation4], 1 }

</bundles_post_ra>
